<compile_context>
chip_gen: v7x
topology: tpu7x:2x2x1
jax: 0.10.0
libtpu: 0.0.40
codegen_flags: <defaults>
</compile_context>

<pallas_src>
import jax
import jax.numpy as jnp
from jax.experimental import pallas as pl
from jax.experimental.pallas import tpu as pltpu

KSIZES = (40, 20, 10)                 # InceptionModule kernel_size list
K_MAX = max(KSIZES)                   # 40
LPAD = (K_MAX - 1) // 2               # 19 (PyTorch 'same' left pad for k=40)


def _round_up(x, m):
    return (x + m - 1) // m * m


def inception_module(x, wb, w1, w2, w3, wm, *, matmul_dtype=jnp.float32):
    """x: (B, Cin, L) f32 -> (B, 4*Cout, L) f32.

    matmul_dtype : dtype of the MXU operands (jnp.bfloat16 recommended on
                   v6e/v7x); accumulation is always f32.
    """
    B, Cin, L = x.shape
    Cout = wb.shape[0]

    # Fold the 1x1 bottleneck into the conv weights whenever it does not shrink
    # the channel count.  Exact linear composition, so semantics are unchanged.
    fold = Cin <= Cout

    T = K_MAX                              # taps of the widest 'same' window
    n_out = _round_up(L, 128)              # lane-dense output width per element
    n_in = _round_up(n_out + T, 128)       # covers all shifted windows + halo

    Csrc = Cin if fold else Cout           # channels feeding the im2col
    Cs_p = _round_up(Csrc, 8)              # sublane-aligned im2col channel rows
    Cx = Cs_p if fold else Cin             # channel rows of the padded input

    # ---- host-side layout plumbing (free) ------------------------------------
    xin = x
    if fold and Cx != Cin:
        xin = jnp.pad(x, ((0, 0), (0, Cx - Cin), (0, 0)))        # zero channels
    # Per-element zero padding: LPAD zeros on the left, rest on the right.
    xpad = jnp.pad(xin, ((0, 0), (0, 0), (LPAD, n_in - LPAD - L)))

    # Merge the three conv branches into one zero-embedded im2col weight.
    # Flattened contraction-column order: (tap r, channel c) -> r*Cs_p + c.
    wfull = jnp.zeros((3 * Cout, T, Cs_p), jnp.float32)
    for i, (k, w) in enumerate(zip(KSIZES, (w1, w2, w3))):
        off = LPAD - (k - 1) // 2          # tap offset inside the max window
        w_ = w.astype(jnp.float32)         # (Cout, Cout, k)
        if fold:                           # compose with bottleneck -> (Cout, Cin, k)
            w_ = jnp.einsum('ock,ci->oik', w_, wb.astype(jnp.float32))
        wt = jnp.transpose(w_, (0, 2, 1))  # (Cout, k, Csrc)
        wfull = wfull.at[i * Cout:(i + 1) * Cout, off:off + k, :Csrc].set(wt)
    wconv = wfull.reshape(3 * Cout, T * Cs_p).astype(matmul_dtype)

    wm2 = wm.astype(matmul_dtype)                      # maxconv 1x1 (Cout, Cin)
    if fold and Cx != Cin:
        wm2 = jnp.pad(wm2, ((0, 0), (0, Cx - Cin)))    # zero cols for pad chans
    if not fold:
        wb2 = wb.astype(matmul_dtype)                  # bottleneck (Cout, Cin)
        if Cs_p != Cout:
            wb2 = jnp.pad(wb2, ((0, Cs_p - Cout), (0, 0)))

    def kernel(*refs):
        if fold:
            xp_ref, wc_ref, wm_ref, o_ref = refs
        else:
            xp_ref, wb_ref, wc_ref, wm_ref, o_ref = refs
        xp = xp_ref[0]                                             # (Cx, n_in)

        # im2col source: either the (padded) input directly (bottleneck folded
        # into the weights) or the bottleneck output computed on the MXU.
        # Pointwise conv on zero-padding keeps zeros, so padded cols stay valid.
        if fold:
            xs = xp.astype(matmul_dtype)                           # (Cs_p, n_in)
        else:
            xs = jnp.dot(wb_ref[...], xp.astype(matmul_dtype),
                         preferred_element_type=jnp.float32).astype(matmul_dtype)

        # Single im2col matmul for the three merged conv branches: T shifted
        # windows of xs stacked on sublanes -> one MXU matmul, contraction
        # width T*Cs_p (>= 256).  Every slice is a whole sublane tile.
        patch = jnp.concatenate([xs[:, r:r + n_out] for r in range(T)], axis=0)
        conv_out = jnp.dot(wc_ref[...], patch,
                           preferred_element_type=jnp.float32)     # (3*Cout, n_out)

        # MaxPool1d(3, stride=1, padding=1) on the ORIGINAL input.  PyTorch pads
        # with -inf for max pooling; our buffer is zero-padded for the convs, so
        # mask the out-of-range neighbours back to -inf (elementwise stays f32).
        xc = xp[:, LPAD:LPAD + n_out]
        xl = xp[:, LPAD - 1:LPAD - 1 + n_out]
        xr = xp[:, LPAD + 1:LPAD + 1 + n_out]
        t = jax.lax.broadcasted_iota(jnp.int32, xc.shape, 1)
        neg_inf = jnp.float32(-jnp.inf)
        xl = jnp.where(t == 0, neg_inf, xl)
        xr = jnp.where(t == L - 1, neg_inf, xr)
        mp = jnp.maximum(jnp.maximum(xl, xc), xr).astype(matmul_dtype)
        mconv = jnp.dot(wm_ref[...], mp, preferred_element_type=jnp.float32)

        # Direct slice stores (no concatenate repack); lane-dense (n_out % 128 == 0).
        o_ref[0, 0:3 * Cout, :] = jnp.maximum(conv_out, 0.0).astype(o_ref.dtype)
        o_ref[0, 3 * Cout:4 * Cout, :] = jnp.maximum(mconv, 0.0).astype(o_ref.dtype)

    in_arrays = [xpad]
    in_specs = [pl.BlockSpec((1, Cx, n_in), lambda b: (b, 0, 0))]
    if not fold:
        in_arrays.append(wb2)
        in_specs.append(pl.BlockSpec((Cs_p, Cin), lambda b: (0, 0)))
    in_arrays += [wconv, wm2]
    in_specs += [pl.BlockSpec((3 * Cout, T * Cs_p), lambda b: (0, 0)),
                 pl.BlockSpec((Cout, Cx), lambda b: (0, 0))]

    flops = 2 * B * ((0 if fold else Cs_p * Cin * n_in)
                     + (3 * Cout) * (T * Cs_p) * n_out
                     + Cout * Cx * n_out)
    bytes_accessed = 4 * (B * Cx * n_in + B * 4 * Cout * n_out
                          + 3 * Cout * T * Cs_p + Cout * Cx
                          + (0 if fold else Cs_p * Cin))

    out = pl.pallas_call(
        kernel,
        out_shape=jax.ShapeDtypeStruct((B, 4 * Cout, n_out), jnp.float32),
        grid_spec=pltpu.PrefetchScalarGridSpec(
            num_scalar_prefetch=0,
            grid=(B,),
            in_specs=in_specs,
            out_specs=pl.BlockSpec((1, 4 * Cout, n_out), lambda b: (b, 0, 0)),
        ),
        compiler_params=pltpu.CompilerParams(
            dimension_semantics=("parallel",)),
        cost_estimate=pl.CostEstimate(
            flops=flops, transcendentals=0, bytes_accessed=bytes_accessed),
    )(*in_arrays)

    # TODO(synk): for very long sequences (L in the many thousands / v7x 64 MiB
    # VMEM), tile the lane axis with a (K_MAX-1)-element halo (extra grid axis)
    # instead of whole-L blocks.
    return out[:, :, :L]


# ----------------------------- pure-JAX reference ----------------------------
def _conv1d_same_ref(x, w):
    k = w.shape[-1]
    lp = (k - 1) // 2
    rp = (k - 1) - lp
    return jax.lax.conv_general_dilated(
        x, w, window_strides=(1,), padding=[(lp, rp)],
        dimension_numbers=("NCH", "OIH", "NCH"))


def inception_reference(x, wb, w1, w2, w3, wm):
    xb = _conv1d_same_ref(x, wb[:, :, None])
    o1 = _conv1d_same_ref(xb, w1)
    o2 = _conv1d_same_ref(xb, w2)
    o3 = _conv1d_same_ref(xb, w3)
    mp = jax.lax.reduce_window(
        x, -jnp.inf, jax.lax.max,
        window_dimensions=(1, 1, 3), window_strides=(1, 1, 1),
        padding=[(0, 0), (0, 0), (1, 1)])
    om = _conv1d_same_ref(mp, wm[:, :, None])
    return jnp.maximum(jnp.concatenate([o1, o2, o3, om], axis=1), 0.0)


# ----------------------------------- main -------------------------------------
if __name__ == "__main__":
    B, Cin, Cout, L = 2, 4, 8, 64

    key = jax.random.PRNGKey(0)
    kx, kb, k1, k2, k3, km = jax.random.split(key, 6)

    x = jax.random.normal(kx, (B, Cin, L), dtype=jnp.float32)

    # Deterministic synthetic weights (shapes from the module's __init__;
    # Conv1d weight layout = (out_channels, in_channels, kernel_size), no bias).
    def winit(k, shape):
        fan_in = shape[1] * (shape[2] if len(shape) > 2 else 1)
        return jax.random.normal(k, shape, dtype=jnp.float32) / jnp.sqrt(float(fan_in))

    wb = winit(kb, (Cout, Cin, 1))[:, :, 0]          # bottleneck 1x1
    w1 = winit(k1, (Cout, Cout, KSIZES[0]))          # k=40
    w2 = winit(k2, (Cout, Cout, KSIZES[1]))          # k=20
    w3 = winit(k3, (Cout, Cout, KSIZES[2]))          # k=10
    wm = winit(km, (Cout, Cin, 1))[:, :, 0]          # maxconv 1x1

    # f32 MXU operands here for a tight correctness check; on v6e/v7x pass
    # matmul_dtype=jnp.bfloat16.
    out = jax.block_until_ready(inception_module(x, wb, w1, w2, w3, wm))
    ref = jax.block_until_ready(inception_reference(x, wb, w1, w2, w3, wm))

    assert out.shape == (B, 4 * Cout, L), out.shape
    assert jnp.allclose(out, ref, atol=2e-2, rtol=2e-2), float(jnp.max(jnp.abs(out - ref)))

    print("KERNEL_OK")
</pallas_src>

<mosaic_0001>
module attributes {stable_mosaic.version = 11 : i64} {
  func.func @kernel(%arg0: i32, %arg1: memref<1x8x256xf32, #tpu.memory_space<vmem>>, %arg2: memref<24x320xf32, #tpu.memory_space<vmem>>, %arg3: memref<8x8xf32, #tpu.memory_space<vmem>>, %arg4: memref<1x32x128xf32, #tpu.memory_space<vmem>>) attributes {dimension_semantics = [#tpu.dimension_semantics<parallel>], iteration_bounds = array<i64: 2>, scalar_prefetch = 0 : i64, scratch_operands = 0 : i64, tpu.core_type = #tpu.core_type<tc>, window_params = [{transform_indices = @transform_0, window_bounds = array<i64: 1, 8, 256>}, {pipeline_mode = #tpu.pipeline_mode<synchronous>, transform_indices = @transform_1, window_bounds = array<i64: 24, 320>}, {pipeline_mode = #tpu.pipeline_mode<synchronous>, transform_indices = @transform_2, window_bounds = array<i64: 8, 8>}, {transform_indices = @transform_3, window_bounds = array<i64: 1, 32, 128>}]} {
    %c0 = arith.constant 0 : index
    %c0_0 = arith.constant 0 : index
    %c0_1 = arith.constant 0 : index
    %0 = vector.load %arg1[%c0, %c0_0, %c0_1] : memref<1x8x256xf32, #tpu.memory_space<vmem>>, vector<1x8x256xf32>
    %1 = vector.shape_cast %0 : vector<1x8x256xf32> to vector<8x256xf32>
    %2 = vector.extract_strided_slice %1 {offsets = [0, 0], sizes = [8, 128], strides = [1, 1]} : vector<8x256xf32> to vector<8x128xf32>
    %3 = vector.extract_strided_slice %1 {offsets = [0, 1], sizes = [8, 128], strides = [1, 1]} : vector<8x256xf32> to vector<8x128xf32>
    %4 = vector.extract_strided_slice %1 {offsets = [0, 2], sizes = [8, 128], strides = [1, 1]} : vector<8x256xf32> to vector<8x128xf32>
    %5 = vector.extract_strided_slice %1 {offsets = [0, 3], sizes = [8, 128], strides = [1, 1]} : vector<8x256xf32> to vector<8x128xf32>
    %6 = vector.extract_strided_slice %1 {offsets = [0, 4], sizes = [8, 128], strides = [1, 1]} : vector<8x256xf32> to vector<8x128xf32>
    %7 = vector.extract_strided_slice %1 {offsets = [0, 5], sizes = [8, 128], strides = [1, 1]} : vector<8x256xf32> to vector<8x128xf32>
    %8 = vector.extract_strided_slice %1 {offsets = [0, 6], sizes = [8, 128], strides = [1, 1]} : vector<8x256xf32> to vector<8x128xf32>
    %9 = vector.extract_strided_slice %1 {offsets = [0, 7], sizes = [8, 128], strides = [1, 1]} : vector<8x256xf32> to vector<8x128xf32>
    %10 = vector.extract_strided_slice %1 {offsets = [0, 8], sizes = [8, 128], strides = [1, 1]} : vector<8x256xf32> to vector<8x128xf32>
    %11 = vector.extract_strided_slice %1 {offsets = [0, 9], sizes = [8, 128], strides = [1, 1]} : vector<8x256xf32> to vector<8x128xf32>
    %12 = vector.extract_strided_slice %1 {offsets = [0, 10], sizes = [8, 128], strides = [1, 1]} : vector<8x256xf32> to vector<8x128xf32>
    %13 = vector.extract_strided_slice %1 {offsets = [0, 11], sizes = [8, 128], strides = [1, 1]} : vector<8x256xf32> to vector<8x128xf32>
    %14 = vector.extract_strided_slice %1 {offsets = [0, 12], sizes = [8, 128], strides = [1, 1]} : vector<8x256xf32> to vector<8x128xf32>
    %15 = vector.extract_strided_slice %1 {offsets = [0, 13], sizes = [8, 128], strides = [1, 1]} : vector<8x256xf32> to vector<8x128xf32>
    %16 = vector.extract_strided_slice %1 {offsets = [0, 14], sizes = [8, 128], strides = [1, 1]} : vector<8x256xf32> to vector<8x128xf32>
    %17 = vector.extract_strided_slice %1 {offsets = [0, 15], sizes = [8, 128], strides = [1, 1]} : vector<8x256xf32> to vector<8x128xf32>
    %18 = vector.extract_strided_slice %1 {offsets = [0, 16], sizes = [8, 128], strides = [1, 1]} : vector<8x256xf32> to vector<8x128xf32>
    %19 = vector.extract_strided_slice %1 {offsets = [0, 17], sizes = [8, 128], strides = [1, 1]} : vector<8x256xf32> to vector<8x128xf32>
    %20 = vector.extract_strided_slice %1 {offsets = [0, 18], sizes = [8, 128], strides = [1, 1]} : vector<8x256xf32> to vector<8x128xf32>
    %21 = vector.extract_strided_slice %1 {offsets = [0, 19], sizes = [8, 128], strides = [1, 1]} : vector<8x256xf32> to vector<8x128xf32>
    %22 = vector.extract_strided_slice %1 {offsets = [0, 20], sizes = [8, 128], strides = [1, 1]} : vector<8x256xf32> to vector<8x128xf32>
    %23 = vector.extract_strided_slice %1 {offsets = [0, 21], sizes = [8, 128], strides = [1, 1]} : vector<8x256xf32> to vector<8x128xf32>
    %24 = vector.extract_strided_slice %1 {offsets = [0, 22], sizes = [8, 128], strides = [1, 1]} : vector<8x256xf32> to vector<8x128xf32>
    %25 = vector.extract_strided_slice %1 {offsets = [0, 23], sizes = [8, 128], strides = [1, 1]} : vector<8x256xf32> to vector<8x128xf32>
    %26 = vector.extract_strided_slice %1 {offsets = [0, 24], sizes = [8, 128], strides = [1, 1]} : vector<8x256xf32> to vector<8x128xf32>
    %27 = vector.extract_strided_slice %1 {offsets = [0, 25], sizes = [8, 128], strides = [1, 1]} : vector<8x256xf32> to vector<8x128xf32>
    %28 = vector.extract_strided_slice %1 {offsets = [0, 26], sizes = [8, 128], strides = [1, 1]} : vector<8x256xf32> to vector<8x128xf32>
    %29 = vector.extract_strided_slice %1 {offsets = [0, 27], sizes = [8, 128], strides = [1, 1]} : vector<8x256xf32> to vector<8x128xf32>
    %30 = vector.extract_strided_slice %1 {offsets = [0, 28], sizes = [8, 128], strides = [1, 1]} : vector<8x256xf32> to vector<8x128xf32>
    %31 = vector.extract_strided_slice %1 {offsets = [0, 29], sizes = [8, 128], strides = [1, 1]} : vector<8x256xf32> to vector<8x128xf32>
    %32 = vector.extract_strided_slice %1 {offsets = [0, 30], sizes = [8, 128], strides = [1, 1]} : vector<8x256xf32> to vector<8x128xf32>
    %33 = vector.extract_strided_slice %1 {offsets = [0, 31], sizes = [8, 128], strides = [1, 1]} : vector<8x256xf32> to vector<8x128xf32>
    %34 = vector.extract_strided_slice %1 {offsets = [0, 32], sizes = [8, 128], strides = [1, 1]} : vector<8x256xf32> to vector<8x128xf32>
    %35 = vector.extract_strided_slice %1 {offsets = [0, 33], sizes = [8, 128], strides = [1, 1]} : vector<8x256xf32> to vector<8x128xf32>
    %36 = vector.extract_strided_slice %1 {offsets = [0, 34], sizes = [8, 128], strides = [1, 1]} : vector<8x256xf32> to vector<8x128xf32>
    %37 = vector.extract_strided_slice %1 {offsets = [0, 35], sizes = [8, 128], strides = [1, 1]} : vector<8x256xf32> to vector<8x128xf32>
    %38 = vector.extract_strided_slice %1 {offsets = [0, 36], sizes = [8, 128], strides = [1, 1]} : vector<8x256xf32> to vector<8x128xf32>
    %39 = vector.extract_strided_slice %1 {offsets = [0, 37], sizes = [8, 128], strides = [1, 1]} : vector<8x256xf32> to vector<8x128xf32>
    %40 = vector.extract_strided_slice %1 {offsets = [0, 38], sizes = [8, 128], strides = [1, 1]} : vector<8x256xf32> to vector<8x128xf32>
    %41 = vector.extract_strided_slice %1 {offsets = [0, 39], sizes = [8, 128], strides = [1, 1]} : vector<8x256xf32> to vector<8x128xf32>
    %42 = tpu.concatenate %2, %3, %4, %5, %6, %7, %8, %9, %10, %11, %12, %13, %14, %15, %16, %17 in 0 : vector<8x128xf32>, vector<8x128xf32>, vector<8x128xf32>, vector<8x128xf32>, vector<8x128xf32>, vector<8x128xf32>, vector<8x128xf32>, vector<8x128xf32>, vector<8x128xf32>, vector<8x128xf32>, vector<8x128xf32>, vector<8x128xf32>, vector<8x128xf32>, vector<8x128xf32>, vector<8x128xf32>, vector<8x128xf32> -> vector<128x128xf32>
    %43 = tpu.concatenate %18, %19, %20, %21, %22, %23, %24, %25, %26, %27, %28, %29, %30, %31, %32, %33 in 0 : vector<8x128xf32>, vector<8x128xf32>, vector<8x128xf32>, vector<8x128xf32>, vector<8x128xf32>, vector<8x128xf32>, vector<8x128xf32>, vector<8x128xf32>, vector<8x128xf32>, vector<8x128xf32>, vector<8x128xf32>, vector<8x128xf32>, vector<8x128xf32>, vector<8x128xf32>, vector<8x128xf32>, vector<8x128xf32> -> vector<128x128xf32>
    %44 = tpu.concatenate %34, %35, %36, %37, %38, %39, %40, %41 in 0 : vector<8x128xf32>, vector<8x128xf32>, vector<8x128xf32>, vector<8x128xf32>, vector<8x128xf32>, vector<8x128xf32>, vector<8x128xf32>, vector<8x128xf32> -> vector<64x128xf32>
    %45 = tpu.concatenate %42, %43, %44 in 0 : vector<128x128xf32>, vector<128x128xf32>, vector<64x128xf32> -> vector<320x128xf32>
    %c0_2 = arith.constant 0 : index
    %c0_3 = arith.constant 0 : index
    %46 = vector.load %arg2[%c0_2, %c0_3] : memref<24x320xf32, #tpu.memory_space<vmem>>, vector<24x320xf32>
    %cst = arith.constant dense<0.000000e+00> : vector<24x128xf32>
    %47 = tpu.matmul %46, %45, %cst {dimension_numbers = #tpu.dot_dimension_numbers<[1], [0], [0], [1], [0, 0, 1, 1], [], []>} : vector<24x320xf32>, vector<320x128xf32>, vector<24x128xf32> -> vector<24x128xf32>
    %48 = vector.extract_strided_slice %1 {offsets = [0, 19], sizes = [8, 128], strides = [1, 1]} : vector<8x256xf32> to vector<8x128xf32>
    %49 = vector.extract_strided_slice %1 {offsets = [0, 18], sizes = [8, 128], strides = [1, 1]} : vector<8x256xf32> to vector<8x128xf32>
    %50 = vector.extract_strided_slice %1 {offsets = [0, 20], sizes = [8, 128], strides = [1, 1]} : vector<8x256xf32> to vector<8x128xf32>
    %51 = tpu.iota {dimensions = array<i32: 1>} : vector<8x128xi32>
    %c0_i32 = arith.constant 0 : i32
    %52 = vector.broadcast %c0_i32 : i32 to vector<8x128xi32>
    %53 = arith.cmpi eq, %51, %52 : vector<8x128xi32>
    %cst_4 = arith.constant 0xFF800000 : f32
    %54 = vector.broadcast %cst_4 : f32 to vector<8x128xf32>
    %55 = arith.select %53, %54, %49 : vector<8x128xi1>, vector<8x128xf32>
    %c63_i32 = arith.constant 63 : i32
    %56 = vector.broadcast %c63_i32 : i32 to vector<8x128xi32>
    %57 = arith.cmpi eq, %51, %56 : vector<8x128xi32>
    %cst_5 = arith.constant 0xFF800000 : f32
    %58 = vector.broadcast %cst_5 : f32 to vector<8x128xf32>
    %59 = arith.select %57, %58, %50 : vector<8x128xi1>, vector<8x128xf32>
    %60 = arith.maximumf %55, %48 : vector<8x128xf32>
    %61 = arith.maximumf %60, %59 : vector<8x128xf32>
    %c0_6 = arith.constant 0 : index
    %c0_7 = arith.constant 0 : index
    %62 = vector.load %arg3[%c0_6, %c0_7] : memref<8x8xf32, #tpu.memory_space<vmem>>, vector<8x8xf32>
    %cst_8 = arith.constant dense<0.000000e+00> : vector<8x128xf32>
    %63 = tpu.matmul %62, %61, %cst_8 {dimension_numbers = #tpu.dot_dimension_numbers<[1], [0], [0], [1], [0, 0, 1, 1], [], []>} : vector<8x8xf32>, vector<8x128xf32>, vector<8x128xf32> -> vector<8x128xf32>
    %cst_9 = arith.constant 0.000000e+00 : f32
    %64 = vector.broadcast %cst_9 : f32 to vector<24x128xf32>
    %65 = arith.maximumf %47, %64 : vector<24x128xf32>
    %c0_10 = arith.constant 0 : index
    %c0_11 = arith.constant 0 : index
    %c0_12 = arith.constant 0 : index
    %66 = vector.load %arg4[%c0_10, %c0_11, %c0_12] : memref<1x32x128xf32, #tpu.memory_space<vmem>>, vector<1x24x128xf32>
    %67 = vector.shape_cast %66 : vector<1x24x128xf32> to vector<24x128xf32>
    %68 = vector.shape_cast %65 : vector<24x128xf32> to vector<1x24x128xf32>
    tpu.vector_store %arg4[%c0_10, %c0_11, %c0_12], %68 {strides = array<i32>} : memref<1x32x128xf32, #tpu.memory_space<vmem>>, vector<1x24x128xf32>,
    %cst_13 = arith.constant 0.000000e+00 : f32
    %69 = vector.broadcast %cst_13 : f32 to vector<8x128xf32>
    %70 = arith.maximumf %63, %69 : vector<8x128xf32>
    %c0_14 = arith.constant 0 : index
    %c24 = arith.constant 24 : index
    %c0_15 = arith.constant 0 : index
    %71 = vector.load %arg4[%c0_14, %c24, %c0_15] : memref<1x32x128xf32, #tpu.memory_space<vmem>>, vector<1x8x128xf32>
    %72 = vector.shape_cast %71 : vector<1x8x128xf32> to vector<8x128xf32>
    %73 = vector.shape_cast %70 : vector<8x128xf32> to vector<1x8x128xf32>
    tpu.vector_store %arg4[%c0_14, %c24, %c0_15], %73 {strides = array<i32>} : memref<1x32x128xf32, #tpu.memory_space<vmem>>, vector<1x8x128xf32>,
    return
  }
  func.func @transform_0(%arg0: i32) -> (i32, i32, i32) {
    %c0_i32 = arith.constant 0 : i32
    %c0_i32_0 = arith.constant 0 : i32
    %c0_i32_1 = arith.constant 0 : i32
    return %arg0, %c0_i32, %c0_i32_0 : i32, i32, i32
  }
  func.func @transform_1(%arg0: i32) -> (i32, i32) {
    %c0_i32 = arith.constant 0 : i32
    %c0_i32_0 = arith.constant 0 : i32
    %c0_i32_1 = arith.constant 0 : i32
    return %c0_i32, %c0_i32_0 : i32, i32
  }
  func.func @transform_2(%arg0: i32) -> (i32, i32) {
    %c0_i32 = arith.constant 0 : i32
    %c0_i32_0 = arith.constant 0 : i32
    %c0_i32_1 = arith.constant 0 : i32
    return %c0_i32, %c0_i32_0 : i32, i32
  }
  func.func @transform_3(%arg0: i32) -> (i32, i32, i32) {
    %c0_i32 = arith.constant 0 : i32
    %c0_i32_0 = arith.constant 0 : i32
    %c0_i32_1 = arith.constant 0 : i32
    return %arg0, %c0_i32, %c0_i32_0 : i32, i32, i32
  }
}

</mosaic_0001>

<bundles_post_ra>
// kernel: tpu_custom_call.1
= control target key start
LH: loop header
LB: loop body
LE: loop exit
PB: predicated region body
PF: predicated region fallthrough
CT: control target
= control target key end

     0   :  { %8 = vsyncpa [#allocation3], 0  ;;  %s1938_s0 = inlined_call_operand.hbm [shape: f32[2,8,256], index: 0, kind: input, shape index: {}]   ;;  %s1939_s1 = inlined_call_operand.hbm [shape: f32[24,320], index: 1, kind: input, shape index: {}]   ;;  %s1940_s2 = inlined_call_operand.hbm [shape: f32[8,8], index: 2, kind: input, shape index: {}]   ;;  %s1941_s3 = inlined_call_operand.hbm [shape: f32[2,32,128], index: 3, kind: output, shape index: {}]  }
   0x1   :  { %10 = vsyncpa [#allocation3 + $0x1], 0 }
   0x2   :  { %11 = vsyncpa [#allocation6], 0 }
   0x3   :  { %12 = vsyncpa [#allocation4], 0 }
   0x4   :  { %14 = vsyncpa [#allocation4 + $0x1], 0  ;;  %s1516_s12 = smov 0   ;;  %s1518_s13 = smov 0  }
   0x5   :  { %s1520_s14 = smov 0   ;;  %s1522_s15 = smov 0  }
   0x6 LB: > { %s1537_s16 = sadd.s32 4294967295, %s1463_s15   ;;  %s866_s17 = sadd.s32 4294967294, %s1463_s15   ;;  %s1463_s15 = sphi %s1522_s15, %s1961_s15   ;;  %s1459_s14 = sphi %s1520_s14, %s1960_s14   ;;  %s1455_s13 = sphi %s1518_s13, %s1959_s13   ;;  %s1451_s12 = sphi %s1516_s12, %s1958_s12  }
   0x7   : > { %p40_p0 = scmp.ne.s32.totalorder %s1455_s13, %s1451_s12  ;;  %p1942_p1 = scmp.eq.s32.totalorder %s1537_s16, 0 }
   0x8   : > { %p112_p3 = scmp.eq.s32.totalorder %s866_s17, 1  ;;  %p867_p5 = scmp.ge.s32.totalorder %s1463_s15, 1 }
   0x9   : > { %p1546_p4 = por %p1942_p1, %p40_p0  ;;  %p119_p7 = scmp.lt.s32.totalorder %s1463_s15, 3 }
   0xa   : > { %p1551_p6 = por %p112_p3, %p40_p0  ;;  %s1465_s21 = smov [#allocation5]  }
   0xb   : > { %s1945_s18 = scalar_select %p1546_p4, 1, 0 }
   0xc   : > { %s1946_s19 = scalar_select %p1551_p6, 1, 0 }
   0xd   : > { %p1556_p8 = pnand %p867_p5, %p119_p7  ;;  %s131_s22 = sshll.u32 %s1465_s21, 4  ;;  %s1560_s22 = int_to_ptr.vmem [resolvable:$true] %s131_s22 }
   0xe   : > { %s1466_s24 = smov [#allocation7]   ;;  %s1307_s28 = scalar_lea.hbm %s1939_s1, 1152 }
   0xf   : > { %p1030_p9 = pneg %p1556_p8  ;;  %s145_s25 = sshll.u32 %s1466_s24, 4  ;;  %s1571_s25 = int_to_ptr.vmem [resolvable:$true] %s145_s25 }
  0x10   : > { %p1308_p12 = scmp.ne.s32.totalorder %s1939_s1, %s1307_s28  ;;  %p1314_p5 = scmp.lt.u32.totalorder %s1307_s28, %s1939_s1 }
  0x11   : > { %p1567_p11 = pnand %p1030_p9, %p1942_p1 }
  0x13   : > { %p1309_p13 = pneg %p1567_p11 }
  0x15   : > { %p1310_p0 = pnand %p1309_p13, %p1308_p12 }
  0x17   : > { %p1311_p3 = pneg %p1310_p0 }
  0x19   : > { %p1316_p7 = pnand %p1314_p5, %p1311_p3 }
  0x1b   : > { %1319 = shalt.err (!%p1316_p7)
}
  0x1c   : > { %s1320_s6 = scalar_lea.vmem %s1560_s22, 1152  ;;  %p1328_p2 = scmp.lt.s32.totalorder %s1560_s22, %s1560_s22 }
  0x1d   : > { %p1321_p9 = scmp.ne.s32.totalorder %s1560_s22, %s1320_s6  ;;  %p1329_p12 = scmp.lt.s32.totalorder %s1320_s6, %s1320_s6 }
  0x1f   : > { %p1323_p10 = pnand %p1321_p9, %p1309_p13  ;;  %p1330_p0 = por %p1329_p12, %p1328_p2 }
  0x21   : > { %p1324_p1 = pneg %p1323_p10 }
  0x23   : > { %p1331_p6 = pnand %p1330_p0, %p1324_p1 }
  0x25   : > { %1334 = shalt.err (!%p1331_p6)
}
  0x26   : > { %s1467_s7 = smov 384   ;;  %s1468_s8 = smov 24  }
  0x27   : > { %1033 = dma.hbm_to_vmem [thread:$0]  (!%p1567_p11), %s1939_s1, 1152, %s1560_s22, [#allocation6], %s1467_s7, %s1467_s7, %s1468_s8  }
  0x28   : > { %s1335_s21 = scalar_lea.hbm %s1940_s2, 128 }
  0x29   : > { %p1336_p2 = scmp.ne.s32.totalorder %s1940_s2, %s1335_s21  ;;  %p1342_p10 = scmp.lt.u32.totalorder %s1335_s21, %s1940_s2 }
  0x2b   : > { %p1338_p1 = pnand %p1336_p2, %p1309_p13 }
  0x2d   : > { %p1339_p6 = pneg %p1338_p1 }
  0x2f   : > { %p1344_p3 = pnand %p1342_p10, %p1339_p6 }
  0x31   : > { %1347 = shalt.err (!%p1344_p3)
}
  0x32   : > { %s1348_s22 = scalar_lea.vmem %s1571_s25, 128  ;;  %p1356_p12 = scmp.lt.s32.totalorder %s1571_s25, %s1571_s25 }
  0x33   : > { %p1349_p5 = scmp.ne.s32.totalorder %s1571_s25, %s1348_s22  ;;  %p1357_p0 = scmp.lt.s32.totalorder %s1348_s22, %s1348_s22 }
  0x35   : > { %p1351_p7 = pnand %p1349_p5, %p1309_p13  ;;  %p1358_p2 = por %p1357_p0, %p1356_p12 }
  0x37   : > { %p1352_p9 = pneg %p1351_p7 }
  0x39   : > { %p1359_p1 = pnand %p1358_p2, %p1352_p9 }
  0x3b   : > { %1362 = shalt.err (!%p1359_p1)
}
  0x3c   : > { %1036 = dma.hbm_to_vmem [thread:$0]  (!%p1567_p11), %s1940_s2, 128, %s1571_s25, [#allocation6]  }
  0x3d   : > { %s1626_s4 = sadd.s32 1, %s1463_s15   ;;  %s27_s23 = sadd.s32 1, %s1459_s14 }
  0x3e   : > { %s24_s5 = ssub.s32 %s1463_s15, %s1626_s4  ;;  %p34_p13 = scmp.ne.s32.totalorder %s1459_s14, %s1455_s13 }
  0x3f   : > { %p25_p6 = scmp.eq.s32.totalorder %s24_s5, 0  ;;  %p35_p10 = scmp.eq.s32.totalorder %s1463_s15, 0 }
  0x40   : > { %p1949_p3 = scmp.eq.s32.totalorder %s1537_s16, 1  ;;  %p1047_p7 = scmp.lt.s32.totalorder %s1463_s15, 2 }
  0x41   : > { %s1642_s7 = scalar_select %p25_p6, %s1459_s14, %s27_s23  }
  0x42   : > { %p1636_p5 = por %p1949_p3, %p34_p13  ;;  %p36_p9 = por %p35_p10, %p34_p13 }
  0x43   : > { %s156_s8 = sand.u32 1, %s1459_s14   ;;  %s888_s25 = sshll.u32 %s1463_s15, 8 }
  0x44   : > { %s1950_s6 = scalar_select %p1636_p5, 1, 0 }
  0x45   : > { %s871_s9 = sshll.u32 %s156_s8, 4  ;;  %s1649_s17 = scalar_lea.hbm %s1938_s0, %s888_s25 }
  0x46   : > { %s160_s21 = scalar_lea.vmem [#allocation2], %s871_s9  ;;  %p1653_p11 = pnand %p1047_p7, %p36_p9 }
  0x47   : > { %s168_s24 = sshll.u32 %s160_s21, 4  ;;  %s157_s27 = scalar_lea.sflag [#allocation3], %s156_s8  ;;  %s1651_s24 = int_to_ptr.vmem [resolvable:$true] %s168_s24 }
  0x48   : > { %s1363_s28 = scalar_lea.hbm %s1649_s17, 256  ;;  %p1365_p0 = pneg %p1653_p11 }
  0x49   : > { %p1364_p12 = scmp.ne.s32.totalorder %s1649_s17, %s1363_s28  ;;  %s1368_s30 = scalar_lea.hbm %s1938_s0, 512 }
  0x4a   : > { %p1369_p13 = scmp.lt.u32.totalorder %s1649_s17, %s1938_s0  ;;  %p1370_p6 = scmp.lt.u32.totalorder %s1368_s30, %s1363_s28 }
  0x4b   : > { %p1366_p2 = pnand %p1365_p0, %p1364_p12  ;;  %p1372_p3 = scmp.lt.u32.totalorder %s1363_s28, %s1649_s17 }
  0x4c   : > { %p1371_p10 = por %p1370_p6, %p1369_p13 }
  0x4d   : > { %p1367_p1 = pneg %p1366_p2 }
  0x4e   : > { %p1373_p7 = por %p1372_p3, %p1371_p10 }
  0x50   : > { %p1374_p9 = pnand %p1373_p7, %p1367_p1 }
  0x52   : > { %1377 = shalt.err (!%p1374_p9)
}
  0x53   : > { %s1378_s8 = scalar_lea.vmem %s1651_s24, 256  ;;  %s1469_s9 = smov [#allocation2]  }
  0x54   : > { %p1379_p12 = scmp.ne.s32.totalorder %s1651_s24, %s1378_s8  ;;  %s1383_s25 = sshll.u32 %s1469_s9, 4  ;;  %s1384_s25 = int_to_ptr.vmem [resolvable:$false] %s1383_s25 }
  0x55   : > { %s1385_s10 = scalar_lea.vmem %s1384_s25, 512  ;;  %p1386_p4 = scmp.lt.s32.totalorder %s1651_s24, %s1384_s25 }
  0x56   : > { %p1381_p2 = pnand %p1379_p12, %p1365_p0  ;;  %p1387_p13 = scmp.lt.s32.totalorder %s1385_s10, %s1378_s8 }
  0x58   : > { %p1382_p5 = pneg %p1381_p2  ;;  %p1388_p6 = por %p1387_p13, %p1386_p4 }
  0x5a   : > { %p1389_p10 = pnand %p1388_p6, %p1382_p5 }
  0x5c   : > { %1392 = shalt.err (!%p1389_p10)
}
  0x5d   : > { %1040 = dma.hbm_to_vmem [thread:$0]  (!%p1653_p11), %s1649_s17, 256, %s1651_s24, %s157_s27  }
  0x5e   : > { %177 = sbr.rel (%p1556_p8) target bundleno = 637 (0x27d), region = 32  ;;  %s1685_s11 = sand.u32 (!%p1556_p8), 1, %s1455_s13  }
  0x5f   : > { %s875_s21 = sshll.u32 (!%p1556_p8), %s1685_s11, 4  ;;  %s180_s28 = scalar_lea.sflag (!%p1556_p8), [#allocation3], %s1685_s11 }
  0x60   : > { %s183_s22 = scalar_lea.vmem (!%p1556_p8), [#allocation2], %s875_s21  ;;  %p1952_p4 = scmp.ne.s32.totalorder (!%p1556_p8), %s1945_s18, 0 }
  0x65   : > { %1438 = dma.done.wait (%p1952_p4), %s180_s28, 256  }
  0x66   : > { %1440 = vsyncadd (%p1952_p4), %s180_s28, 4294967040  ;;  %p1953_p5 = scmp.eq.s32.totalorder %s1537_s16, 0 }
  0x68   : > { %1442 = dma.done.wait (%p1953_p5), [#allocation6], 1280   ;;  %p1954_p11 = pmov %p1953_p5 }
  0x69   : > { %v1697_v0 = vld [vmem:[%s183_s22] sm:$0xff]  ;;  %v1699_v1 = vld [vmem:[%s183_s22 + $0x8] sm:$0xff]  ;;  %s1470_s20 = smov 127   ;;  %s1471_s17 = smov 125   ;;  %vm222_vm0 = vcmask 1039360   ;;  %vm236_vm1 = vcmask 1022976  }
  0x6a   : > { %1444 = vsyncadd (%p1954_p11), [#allocation6], 4294966016  ;;  %v1112_v2 = vpack.i.bf16 %v1699_v1, %v1697_v0  ;;  %s1472_s24 = smov 126   ;;  %s1473_s18 = smov 124   ;;  %vm229_vm2 = vcmask 1031168   ;;  %vm243_vm3 = vcmask 1014784  }
  0x6b   : > { %s1474_s26 = smov 123   ;;  %s1475_s27 = smov 122   ;;  %vm250_vm4 = vcmask 1006592   ;;  %vm257_vm5 = vcmask 998400   ;;  %vm271_vm6 = vcmask 982016   ;;  %vm264_vm7 = vcmask 990208  }
  0x6c   : > { %1113 = vrot.lane.b32.xlu0 %v1112_v2, %s1470_s20  ;;  %1123 = vrot.lane.b32.xlu1 %v1112_v2, %s1471_s17  ;;  %s1476_s29 = smov 121   ;;  %s1477_s30 = smov 120   ;;  %vm278_vm8 = vcmask 973824   ;;  %vm285_vm9 = vcmask 965632   ;;  %v1487_v54 = vmov 0.0|0.0   ;;  %vm292_vm10 = vcmask 957440  }
  0x6d   : > { %s1478_s23 = smov 119   ;;  %s1479_s5 = smov 118   ;;  %1006 = vmatprep.subr.bf16.mxu1 %v1487_v54  ;;  %vm299_vm11 = vcmask 949248   ;;  %vm306_vm12 = vcmask 941056   ;;  %vm313_vm13 = vcmask 932864   ;;  %vm320_vm14 = vcmask 924672  }
  0x6e   : > { %s1480_s8 = smov 117   ;;  %s1481_s9 = smov 116   ;;  %vm1488_vm15 = vmmov 0  }
  0x6f   : > { %s1482_s25 = smov 115   ;;  %s1483_s10 = smov 114  }
  0x70   : > { %1118 = vrot.lane.b32.xlu0 %v1112_v2, %s1472_s24  ;;  %1128 = vrot.lane.b32.xlu1 %v1112_v2, %s1473_s18  ;;  %s1484_s21 = smov 113   ;;  %s1485_s28 = smov 112  }
  0x71   : > { %s1486_s22 = smov 96   ;;  %s1490_s20 = smov 110  }
  0x72   : > { %s1491_s17 = smov 109   ;;  %s1492_s24 = smov 108  }
  0x73   : > { %s878_s18 = sshll.u32 %s1685_s11, 5  ;;  %p1955_p0 = scmp.ne.s32.totalorder %s1950_s6, 0 }
  0x74   : > { %1133 = vrot.lane.b32.xlu0 %v1112_v2, %s1474_s26  ;;  %1138 = vrot.lane.b32.xlu1 %v1112_v2, %s1475_s27  ;;  %s213_s26 = scalar_lea.vmem [#allocation8], %s878_s18 }
  0x75   : > { %s774_s27 = sshll.u32 %s213_s26, 4  ;;  %s1889_s27 = int_to_ptr.vmem [resolvable:$true] %s774_s27 }
  0x78   : > { %1143 = vrot.lane.b32.xlu0 %v1112_v2, %s1476_s29  ;;  %1148 = vrot.lane.b32.xlu1 %v1112_v2, %s1477_s30  ;;  %s889_s29 = sshll.u32 %s1537_s16, 9  ;;  %s1493_s16 = smov [#allocation8]  }
  0x7c   : > { %1153 = vrot.lane.b32.xlu0 %v1112_v2, %s1478_s23  ;;  %1158 = vrot.lane.b32.xlu1 %v1112_v2, %s1479_s5  ;;  %s1894_s5 = scalar_lea.hbm %s1941_s3, %s889_s29 }
  0x80   : > { %1163 = vrot.lane.b32.xlu0 %v1112_v2, %s1480_s8  ;;  %1168 = vrot.lane.b32.xlu1 %v1112_v2, %s1481_s9  ;;  %s761_s8 = scalar_lea.sflag [#allocation4], %s1685_s11  ;;  %s1393_s9 = scalar_lea.vmem %s1889_s27, 512 }
  0x81   : > { %p1394_p8 = scmp.ne.s32.totalorder %s1889_s27, %s1393_s9 }
  0x83   : > { %p1395_p1 = pnand %p1394_p8, %p1955_p0 }
  0x84   : > { %1173 = vrot.lane.b32.xlu0 %v1112_v2, %s1482_s25  ;;  %1178 = vrot.lane.b32.xlu1 %v1112_v2, %s1483_s10  ;;  %s1397_s25 = sshll.u32 %s1493_s16, 4  ;;  %s1398_s25 = int_to_ptr.vmem [resolvable:$false] %s1397_s25 }
  0x85   : > { %p1396_p3 = pneg %p1395_p1  ;;  %s1399_s10 = scalar_lea.vmem %s1398_s25, 1024 }
  0x86   : > { %p1400_p7 = scmp.lt.s32.totalorder %s1889_s27, %s1398_s25  ;;  %p1401_p9 = scmp.lt.s32.totalorder %s1399_s10, %s1393_s9 }
  0x88   : > { %1183 = vrot.lane.b32.xlu0 %v1112_v2, %s1484_s21  ;;  %1188 = vrot.lane.b32.xlu1 %v1112_v2, %s1485_s28  ;;  %p1402_p12 = por %p1401_p9, %p1400_p7 }
  0x8a   : > { %p1403_p2 = pnand %p1402_p12, %p1396_p3 }
  0x8c   : > { %1193 = vrot.lane.b32.xlu1 %v1112_v2, %s1486_s22 }
  0xde   : > { %v1114_v3 = vpop.permute.xlu0 %1113  ;;  %v1124_v4 = vpop.permute.xlu1 %1123 }
  0xdf   : > { %v1116_v5 = vunpack.i.h.bf16 %v1114_v3  ;;  %v1115_v6 = vunpack.i.l.bf16 %v1114_v3  ;;  %v1126_v7 = vunpack.i.h.bf16 %v1124_v4  ;;  %v1125_v8 = vunpack.i.l.bf16 %v1124_v4 }
  0xe1   : > { %v1705_v9 = vsel %vm222_vm0, %v1115_v6, %v1116_v5  ;;  %v1707_v10 = vsel %vm236_vm1, %v1125_v8, %v1126_v7  ;;  %vm387_vm0 = vcmask 916480   ;;  %vm452_vm1 = vcmask 785408  }
  0xe2   : > { %v1119_v11 = vpop.permute.xlu0 %1118  ;;  %v1710_v12 = vpack.i.bf16 %v1116_v5, %v1705_v9  ;;  %v1129_v13 = vpop.permute.xlu1 %1128  ;;  %v1715_v18 = vpack.i.bf16 %v1126_v7, %v1707_v10 }
  0xe3   : > { %v1121_v14 = vunpack.i.h.bf16 %v1119_v11  ;;  %v1120_v15 = vunpack.i.l.bf16 %v1119_v11  ;;  %v1131_v16 = vunpack.i.h.bf16 %v1129_v13  ;;  %v1130_v17 = vunpack.i.l.bf16 %v1129_v13 }
  0xe4   : > { %1198 = vrot.lane.b32.xlu0 %v1710_v12, %s1485_s28 }
  0xe5   : > { %v1717_v19 = vsel %vm229_vm2, %v1120_v15, %v1121_v14  ;;  %v1719_v20 = vsel %vm243_vm3, %v1130_v17, %v1131_v16  ;;  %vm655_vm2 = vcmask 900096   ;;  %vm478_vm3 = vcmask 523264  }
  0xe6   : > { %v1134_v21 = vpop.permute.xlu0 %1133  ;;  %v1722_v22 = vpack.i.bf16 %v1121_v14, %v1717_v19  ;;  %v1139_v23 = vpop.permute.xlu1 %1138  ;;  %v1729_v28 = vpack.i.bf16 %v1131_v16, %v1719_v20  ;;  %v980_v29 = vpack.c.bf16 %v1707_v10, %v1717_v19 }
  0xe7   : > { %v1136_v24 = vunpack.i.h.bf16 %v1134_v21  ;;  %v1135_v25 = vunpack.i.l.bf16 %v1134_v21  ;;  %v1141_v26 = vunpack.i.h.bf16 %v1139_v23  ;;  %v1140_v27 = vunpack.i.l.bf16 %v1139_v23 }
  0xe8   : > { %1203 = vrot.lane.b32.xlu1 %v1722_v22, %s1485_s28  ;;  %1208 = vrot.lane.b32.xlu0 %v1715_v18, %s1485_s28 }
  0xe9   : > { %v1733_v30 = vsel %vm250_vm4, %v1135_v25, %v1136_v24  ;;  %v1735_v31 = vsel %vm257_vm5, %v1140_v27, %v1141_v26  ;;  %vm672_vm5 = vcmask 891904  }
  0xea   : > { %v1144_v32 = vpop.permute.xlu0 %1143  ;;  %v1738_v33 = vpack.i.bf16 %v1136_v24, %v1733_v30  ;;  %v1149_v34 = vpop.permute.xlu1 %1148  ;;  %v1745_v39 = vpack.i.bf16 %v1141_v26, %v1735_v31  ;;  %v984_v40 = vpack.c.bf16 %v1733_v30, %v1719_v20 }
  0xeb   : > { %v1146_v35 = vunpack.i.h.bf16 %v1144_v32  ;;  %v1145_v36 = vunpack.i.l.bf16 %v1144_v32  ;;  %v1151_v37 = vunpack.i.h.bf16 %v1149_v34  ;;  %v1150_v38 = vunpack.i.l.bf16 %v1149_v34  ;;  %v470_v34 = vld [vmem:[#allocation5 + $0x8] sm:$0xff] }
  0xec   : > { %1213 = vrot.lane.b32.xlu1 %v1729_v28, %s1485_s28  ;;  %1218 = vrot.lane.b32.xlu0 %v1738_v33, %s1485_s28 }
  0xed   : > { %v1749_v41 = vsel %vm271_vm6, %v1150_v38, %v1151_v37  ;;  %v1751_v42 = vsel %vm264_vm7, %v1145_v36, %v1146_v35  ;;  %552 = vmatprep.mubr.f32.mxu0 %v470_v34  ;;  %vm664_vm6 = vcmask 883712  }
  0xee   : > { %v1154_v43 = vpop.permute.xlu0 %1153  ;;  %v1754_v44 = vpack.i.bf16 %v1146_v35, %v1751_v42  ;;  %v1159_v45 = vpop.permute.xlu1 %1158  ;;  %v988_v46 = vpack.c.bf16 %v1751_v42, %v1735_v31  ;;  %v1232_v51 = vpack.i.bf16 %v1151_v37, %v1749_v41 }
  0xef   : > { %v1156_v47 = vunpack.i.h.bf16 %v1154_v43  ;;  %v1155_v48 = vunpack.i.l.bf16 %v1154_v43  ;;  %v1161_v49 = vunpack.i.h.bf16 %v1159_v45  ;;  %v1160_v50 = vunpack.i.l.bf16 %v1159_v45 }
  0xf0   : > { %1223 = vrot.lane.b32.xlu1 %v1745_v39, %s1485_s28  ;;  %1228 = vrot.lane.b32.xlu0 %v1754_v44, %s1485_s28 }
  0xf1   : > { %v1763_v52 = vsel %vm278_vm8, %v1155_v48, %v1156_v47  ;;  %v1765_v53 = vsel %vm285_vm9, %v1160_v50, %v1161_v49  ;;  %vm678_vm8 = vcmask 64512  }
  0xf2   : > { %v1237_v55 = vpack.i.bf16 %v1156_v47, %v1763_v52  ;;  %v1164_v56 = vpop.permute.xlu0 %1163  ;;  %v1169_v57 = vpop.permute.xlu1 %1168  ;;  %v992_v58 = vpack.c.bf16 %v1763_v52, %v1749_v41  ;;  %v1247_v61 = vpack.i.bf16 %v1161_v49, %v1765_v53  ;;  %v976_v49 = vpack.c.bf16 %v1705_v9, %v1697_v0 }
  0xf3   : > { %v1166_v59 = vunpack.i.h.bf16 %v1164_v56  ;;  %v1165_v60 = vunpack.i.l.bf16 %v1164_v56  ;;  %v1171_v63 = vunpack.i.h.bf16 %v1169_v57  ;;  %v1170_v2 = vunpack.i.l.bf16 %v1169_v57 }
  0xf4   : > { %1233 = vrot.lane.b32.xlu1 %v1232_v51, %s1485_s28  ;;  %1238 = vrot.lane.b32.xlu0 %v1237_v55, %s1485_s28 }
  0xf5   : > { %v1774_v62 = vsel %vm292_vm10, %v1165_v60, %v1166_v59  ;;  %v1782_v11 = vsel %vm299_vm11, %v1170_v2, %v1171_v63 }
  0xf6   : > { %v1174_v3 = vpop.permute.xlu0 %1173  ;;  %v1179_v4 = vpop.permute.xlu1 %1178  ;;  %v996_v5 = vpack.c.bf16 %v1774_v62, %v1765_v53  ;;  %v1252_v8 = vpack.i.bf16 %v1166_v59, %v1774_v62  ;;  %v1267_v24 = vpack.i.bf16 %v1171_v63, %v1782_v11 }
  0xf7   : > { %v1176_v6 = vunpack.i.h.bf16 %v1174_v3  ;;  %v1175_v7 = vunpack.i.l.bf16 %v1174_v3  ;;  %v1181_v14 = vunpack.i.h.bf16 %v1179_v4  ;;  %v1180_v15 = vunpack.i.l.bf16 %v1179_v4 }
  0xf8   : > { %1248 = vrot.lane.b32.xlu1 %v1247_v61, %s1485_s28  ;;  %1243 = vrot.lane.b32.xlu0 %v1710_v12, %s1486_s22 }
  0xf9   : > { %v1784_v13 = vsel %vm306_vm12, %v1175_v7, %v1176_v6  ;;  %v1792_v12 = vsel %vm313_vm13, %v1180_v15, %v1181_v14 }
  0xfa   : > { %v1184_v16 = vpop.permute.xlu0 %1183  ;;  %v1000_v17 = vpack.c.bf16 %v1784_v13, %v1782_v11  ;;  %v1272_v27 = vpack.i.bf16 %v1176_v6, %v1784_v13  ;;  %v1287_v32 = vpack.i.bf16 %v1181_v14, %v1792_v12 }
  0xfb   : > { %v1186_v21 = vunpack.i.h.bf16 %v1184_v16  ;;  %v1185_v23 = vunpack.i.l.bf16 %v1184_v16 }
  0xfc   : > { %1258 = vrot.lane.b32.xlu1 %v1722_v22, %s1486_s22  ;;  %1253 = vrot.lane.b32.xlu0 %v1252_v8, %s1485_s28 }
  0xfd   : > { %v1794_v25 = vsel %vm320_vm14, %v1185_v23, %v1186_v21 }
  0xfe   : > { %v1004_v26 = vpack.c.bf16 %v1794_v25, %v1792_v12  ;;  %v1292_v22 = vpack.i.bf16 %v1186_v21, %v1794_v25  ;;  %v472_v12 = vld [vmem:[#allocation5 + $0x18] sm:$0xff] }
 0x100   : > { %1268 = vrot.lane.b32.xlu1 %v1267_v24, %s1485_s28  ;;  %1263 = vrot.lane.b32.xlu0 %v1715_v18, %s1486_s22  ;;  %v1489_v18 = vmov 0.0  }
 0x101   : > { %960 = vmatprep.mubr.msk.f32.mxu1 %vm1488_vm15, %v1489_v18 }
 0x104   : > { %1278 = vrot.lane.b32.xlu1 %v1729_v28, %s1486_s22  ;;  %1273 = vrot.lane.b32.xlu0 %v1272_v27, %s1485_s28  ;;  %v1189_v28 = vpop.permute.xlu1 %1188 }
 0x105   : > { %v1190_v35 = vunpack.i.l.bf16 %v1189_v28 }
 0x108   : > { %1288 = vrot.lane.b32.xlu1 %v1287_v32, %s1485_s28  ;;  %1283 = vrot.lane.b32.xlu0 %v1738_v33, %s1486_s22  ;;  %v1191_v33 = vunpack.i.h.bf16 %v1189_v28  ;;  %v1823_v36 = vpop.permute.xlu1 %1193 }
 0x109   : > { %v1196_v28 = vunpack.i.h.bf16 %v1823_v36 }
 0x10a   : > { %v388_v43 = vsel %vm387_vm0, %v1190_v35, %v1191_v33  ;;  %v1195_v33 = vunpack.i.l.bf16 %v1823_v36 }
 0x10c   : > { %1298 = vrot.lane.b32.xlu1 %v1745_v39, %s1486_s22  ;;  %1293 = vrot.lane.b32.xlu0 %v1292_v22, %s1485_s28  ;;  %v453_v31 = vsel %vm452_vm1, %v1195_v33, %v1196_v28 }
 0x110   : > { %1303 = vrot.lane.b32.xlu0 %v1754_v44, %s1486_s22  ;;  %651 = vrot.lane.b32.xlu1 %v1697_v0, %s1490_s20 }
 0x114   : > { %653 = vrot.lane.b32.xlu0 %v1699_v1, %s1490_s20  ;;  %668 = vrot.lane.b32.xlu1 %v1697_v0, %s1491_s17 }
 0x118   : > { %670 = vrot.lane.b32.xlu0 %v1699_v1, %s1491_s17  ;;  %660 = vrot.lane.b32.xlu1 %v1697_v0, %s1492_s24 }
 0x11c   : > { %662 = vrot.lane.b32.xlu0 %v1699_v1, %s1492_s24 }
 0x156   : > { %v1199_v37 = vpop.permute.xlu0 %1198 }
 0x157   : > { %v1201_v38 = vunpack.i.h.bf16 %v1199_v37  ;;  %v1200_v39 = vunpack.i.l.bf16 %v1199_v37 }
 0x159   : > { %v389_v44 = vsel %vm387_vm0, %v1200_v39, %v1201_v38 }
 0x15a   : > { %v1204_v45 = vpop.permute.xlu1 %1203  ;;  %v1209_v47 = vpop.permute.xlu0 %1208  ;;  %v974_v48 = vpack.c.bf16 %v389_v44, %v388_v43 }
 0x15b   : > { %v1206_v1 = vunpack.i.h.bf16 %v1204_v45  ;;  %v1205_v50 = vunpack.i.l.bf16 %v1204_v45  ;;  %v1211_v51 = vunpack.i.h.bf16 %v1209_v47  ;;  %v1210_v55 = vunpack.i.l.bf16 %v1209_v47 }
 0x15c   : > { %975 = vmatprep.subr.bf16.mxu0 %v974_v48 }
 0x15d   : > { %977 = vmatpush3.bf16.msra.mxu0 %v976_v49  ;;  %v390_v56 = vsel %vm387_vm0, %v1205_v50, %v1206_v1  ;;  %v391_v57 = vsel %vm387_vm0, %v1210_v55, %v1211_v51 }
 0x15e   : > { %v1214_v59 = vpop.permute.xlu1 %1213  ;;  %v1219_v60 = vpop.permute.xlu0 %1218  ;;  %v978_v61 = vpack.c.bf16 %v391_v57, %v390_v56 }
 0x15f   : > { %v1216_v63 = vunpack.i.h.bf16 %v1214_v59  ;;  %v1215_v2 = vunpack.i.l.bf16 %v1214_v59  ;;  %v1221_v3 = vunpack.i.h.bf16 %v1219_v60  ;;  %v1220_v4 = vunpack.i.l.bf16 %v1219_v60 }
 0x160   : > { %979 = vmatprep.subr.bf16.mxu0 %v978_v61 }
 0x161   : > { %981 = vmatpush3.bf16.msra.mxu0 %v980_v29  ;;  %v392_v0 = vsel %vm387_vm0, %v1215_v2, %v1216_v63  ;;  %v393_v9 = vsel %vm387_vm0, %v1220_v4, %v1221_v3 }
 0x162   : > { %v1224_v6 = vpop.permute.xlu1 %1223  ;;  %v1229_v7 = vpop.permute.xlu0 %1228  ;;  %v982_v8 = vpack.c.bf16 %v393_v9, %v392_v0 }
 0x163   : > { %v1226_v14 = vunpack.i.h.bf16 %v1224_v6  ;;  %v1225_v15 = vunpack.i.l.bf16 %v1224_v6  ;;  %v1231_v16 = vunpack.i.h.bf16 %v1229_v7  ;;  %v1230_v21 = vunpack.i.l.bf16 %v1229_v7 }
 0x164   : > { %983 = vmatprep.subr.bf16.mxu0 %v982_v8 }
 0x165   : > { %985 = vmatpush3.bf16.msra.mxu0 %v984_v40  ;;  %v394_v23 = vsel %vm387_vm0, %v1225_v15, %v1226_v14  ;;  %v395_v10 = vsel %vm387_vm0, %v1230_v21, %v1231_v16 }
 0x166   : > { %v1234_v19 = vpop.permute.xlu1 %1233  ;;  %v1239_v29 = vpop.permute.xlu0 %1238  ;;  %v986_v24 = vpack.c.bf16 %v395_v10, %v394_v23 }
 0x167   : > { %v1236_v27 = vunpack.i.h.bf16 %v1234_v19  ;;  %v1235_v32 = vunpack.i.l.bf16 %v1234_v19  ;;  %v1241_v22 = vunpack.i.h.bf16 %v1239_v29  ;;  %v1240_v34 = vunpack.i.l.bf16 %v1239_v29 }
 0x168   : > { %987 = vmatprep.subr.bf16.mxu0 %v986_v24 }
 0x169   : > { %989 = vmatpush3.bf16.msra.mxu0 %v988_v46  ;;  %v396_v20 = vsel %vm387_vm0, %v1235_v32, %v1236_v27  ;;  %v397_v30 = vsel %vm387_vm0, %v1240_v34, %v1241_v22 }
 0x16a   : > { %v1249_v40 = vpop.permute.xlu1 %1248  ;;  %v1244_v35 = vpop.permute.xlu0 %1243  ;;  %v990_v37 = vpack.c.bf16 %v397_v30, %v396_v20  ;;  %v648_v20 = vlaneseq }
 0x16b   : > { %v1251_v38 = vunpack.i.h.bf16 %v1249_v40  ;;  %v1250_v39 = vunpack.i.l.bf16 %v1249_v40  ;;  %v1246_v43 = vunpack.i.h.bf16 %v1244_v35  ;;  %v1245_v44 = vunpack.i.l.bf16 %v1244_v35 }
 0x16c   : > { %991 = vmatprep.subr.bf16.mxu0 %v990_v37  ;;  %v649_v35 = vand.u32 127, %v648_v20 }
 0x16d   : > { %993 = vmatpush3.bf16.msra.mxu0 %v992_v58  ;;  %v454_v42 = vsel %vm452_vm1, %v1245_v44, %v1246_v43  ;;  %v398_v49 = vsel %vm387_vm0, %v1250_v39, %v1251_v38  ;;  %v469_v39 = vld [vmem:[#allocation5] sm:$0xff] }
 0x16e   : > { %v1259_v46 = vpop.permute.xlu1 %1258  ;;  %v1254_v36 = vpop.permute.xlu0 %1253  ;;  %v1007_v45 = vpack.c.bf16 %v454_v42, %v453_v31  ;;  %v473_v31 = vld [vmem:[#allocation5 + $0x20] sm:$0xff]  ;;  %v471_v42 = vld [vmem:[#allocation5 + $0x10] sm:$0xff]  ;;  %vm650_vm4 = vcmp.eq.s32.totalorder %v649_v35, 0  ;;  %vm659_vm7 = vcmp.eq.s32.totalorder %v649_v35, 63 }
 0x16f   : > { %v1256_v47 = vunpack.i.h.bf16 %v1254_v36  ;;  %v1255_v48 = vunpack.i.l.bf16 %v1254_v36  ;;  %v1261_v1 = vunpack.i.h.bf16 %v1259_v46  ;;  %v1260_v50 = vunpack.i.l.bf16 %v1259_v46 }
 0x170   : > { %1008 = vmatpush3.bf16.msra.mxu1 %v1007_v45 }
 0x171   : > { %v399_v51 = vsel %vm387_vm0, %v1255_v48, %v1256_v47  ;;  %1009 = vmatprep.subr.bf16.mxu1 %v1487_v54  ;;  %v455_v60 = vsel %vm452_vm1, %v1260_v50, %v1261_v1  ;;  %v474_v48 = vld [vmem:[#allocation5 + $0x28] sm:$0xff] }
 0x172   : > { %v1269_v41 = vpop.permute.xlu1 %1268  ;;  %v1264_v52 = vpop.permute.xlu0 %1263  ;;  %v994_v58 = vpack.c.bf16 %v399_v51, %v398_v49  ;;  %v475_v49 = vld [vmem:[#allocation5 + $0x30] sm:$0xff] }
 0x173   : > { %v1271_v55 = vunpack.i.h.bf16 %v1269_v41  ;;  %v1270_v56 = vunpack.i.l.bf16 %v1269_v41  ;;  %v1266_v57 = vunpack.i.h.bf16 %v1264_v52  ;;  %v1265_v59 = vunpack.i.l.bf16 %v1264_v52 }
 0x174   : > { %995 = vmatprep.subr.bf16.mxu0 %v994_v58  ;;  %v477_v58 = vld [vmem:[#allocation5 + $0x40] sm:$0xff] }
 0x175   : > { %997 = vmatpush3.bf16.msra.mxu0 %v996_v5  ;;  %v456_v61 = vsel %vm452_vm1, %v1265_v59, %v1266_v57  ;;  %v400_v9 = vsel %vm387_vm0, %v1270_v56, %v1271_v55  ;;  %v677_v55 = vld [vmem:[#allocation7] sm:$0xff] }
 0x176   : > { %v1279_v63 = vpop.permute.xlu1 %1278  ;;  %v1274_v2 = vpop.permute.xlu0 %1273  ;;  %v1010_v3 = vpack.c.bf16 %v456_v61, %v455_v60 }
 0x177   : > { %v1276_v4 = vunpack.i.h.bf16 %v1274_v2  ;;  %v1275_v0 = vunpack.i.l.bf16 %v1274_v2  ;;  %v1281_v6 = vunpack.i.h.bf16 %v1279_v63  ;;  %v1280_v7 = vunpack.i.l.bf16 %v1279_v63 }
 0x178   : > { %1011 = vmatpush3.bf16.msra.mxu1 %v1010_v3 }
 0x179   : > { %v401_v8 = vsel %vm387_vm0, %v1275_v0, %v1276_v4  ;;  %1012 = vmatprep.subr.bf16.mxu1 %v1487_v54  ;;  %v457_v23 = vsel %vm452_vm1, %v1280_v7, %v1281_v6 }
 0x17a   : > { %v1289_v53 = vpop.permute.xlu1 %1288  ;;  %v1284_v62 = vpop.permute.xlu0 %1283  ;;  %v998_v5 = vpack.c.bf16 %v401_v8, %v400_v9 }
 0x17b   : > { %v1291_v14 = vunpack.i.h.bf16 %v1289_v53  ;;  %v1290_v15 = vunpack.i.l.bf16 %v1289_v53  ;;  %v1286_v16 = vunpack.i.h.bf16 %v1284_v62  ;;  %v1285_v21 = vunpack.i.l.bf16 %v1284_v62 }
 0x17c   : > { %999 = vmatprep.subr.bf16.mxu0 %v998_v5 }
 0x17d   : > { %1001 = vmatpush3.bf16.msra.mxu0 %v1000_v17  ;;  %v458_v10 = vsel %vm452_vm1, %v1285_v21, %v1286_v16  ;;  %v402_v22 = vsel %vm387_vm0, %v1290_v15, %v1291_v14 }
 0x17e   : > { %v1299_v19 = vpop.permute.xlu1 %1298  ;;  %v1294_v29 = vpop.permute.xlu0 %1293  ;;  %v1013_v24 = vpack.c.bf16 %v458_v10, %v457_v23 }
 0x17f   : > { %v1296_v27 = vunpack.i.h.bf16 %v1294_v29  ;;  %v1295_v32 = vunpack.i.l.bf16 %v1294_v29  ;;  %v1301_v34 = vunpack.i.h.bf16 %v1299_v19  ;;  %v1300_v28 = vunpack.i.l.bf16 %v1299_v19 }
 0x180   : > { %1014 = vmatpush3.bf16.msra.mxu1 %v1013_v24 }
 0x181   : > { %v403_v33 = vsel %vm387_vm0, %v1295_v32, %v1296_v27  ;;  %1015 = vmatprep.subr.bf16.mxu1 %v1487_v54  ;;  %v459_v37 = vsel %vm452_vm1, %v1300_v28, %v1301_v34 }
 0x182   : > { %v1304_v11 = vpop.permute.xlu0 %1303  ;;  %v1002_v13 = vpack.c.bf16 %v403_v33, %v402_v22  ;;  %v652_v17 = vpop.permute.xlu1 %651 }
 0x183   : > { %v1306_v30 = vunpack.i.h.bf16 %v1304_v11  ;;  %v1305_v40 = vunpack.i.l.bf16 %v1304_v11 }
 0x184   : > { %1003 = vmatprep.subr.bf16.mxu0 %v1002_v13 }
 0x185   : > { %1005 = vmatpush3.bf16.msra.mxu0 %v1004_v26  ;;  %v460_v38 = vsel %vm452_vm1, %v1305_v40, %v1306_v30  ;;  %v476_v26 = vld [vmem:[#allocation5 + $0x38] sm:$0xff] }
 0x186   : > { %v654_v43 = vpop.permute.xlu0 %653  ;;  %v1016_v44 = vpack.c.bf16 %v460_v38, %v459_v37  ;;  %v669_v54 = vpop.permute.xlu1 %668 }
 0x187   : > { %v656_v46 = vsel %vm655_vm2, %v652_v17, %v654_v43 }
 0x188   : > { %1017 = vmatpush3.bf16.msra.mxu1 %v1016_v44  ;;  %553 = vmatmul.mubr.f32.vlgmr.msra.gmra.mrb[0].mxu0 %v469_v39  ;;  %v658_v36 = vsel %vm650_vm4, -inf, %v656_v46 }
 0x189   : > { %969 = vmatprep.subr.mxu1 %v1489_v18  ;;  %557 = vmatprep.mubr.f32.mxu0 %v473_v31 }
 0x18a   : > { %v671_v25 = vpop.permute.xlu0 %670  ;;  %v661_v47 = vpop.permute.xlu1 %660 }
 0x18b   : > { %961 = vmatmul.mubr.msk.f32.vlgmr.msra.gmra.mrb[0].mxu1 %vm478_vm3, %v471_v42  ;;  %v673_v45 = vsel %vm672_vm5, %v669_v54, %v671_v25 }
 0x18c   : > { %558 = vmatmul.mubr.f32.gmra.mrb[2].mxu0 %v472_v12  ;;  %963 = vmatprep.mubr.msk.f32.mxu1 %vm1488_vm15, %v1489_v18  ;;  %v675_v50 = vmax.f32 %v658_v36, %v673_v45 }
 0x18d   : > { %562 = vmatprep.mubr.f32.mxu0 %v476_v26 }
 0x18e   : > { %v663_v1 = vpop.permute.xlu0 %662 }
 0x18f   : > { %v665_v51 = vsel %vm664_vm6, %v661_v47, %v663_v1  ;;  %964 = vmatmul.mubr.msk.f32.gmra.mrb[2].mxu1 %vm478_vm3, %v474_v48 }
 0x190   : > { %v667_v41 = vsel %vm659_vm7, -inf, %v665_v51  ;;  %563 = vmatmul.mubr.f32.gmra.mrb[4].mxu0 %v475_v49  ;;  %966 = vmatprep.mubr.msk.f32.mxu1 %vm1488_vm15, %v1489_v18 }
 0x191   : > { %v676_v52 = vmax.f32 %v675_v50, %v667_v41 }
 0x193   : > { %970 = vmatpush3.msra.mxu1 %v676_v52 }
 0x194   : > { %967 = vmatmul.mubr.msk.f32.gmra.mrb[4].mxu1 %vm478_vm3, %v477_v58 }
 0x195   : > { %971 = vmatprep.mubr.msk.f32.mxu1 %vm1488_vm15, %v1489_v18 }
 0x198   : > { %972 = vmatmul.mubr.msk.f32.vlgmr.msra.gmra.mrb[6].mxu1 %vm678_vm8, %v677_v55 }
 0x25b   : > { %v922_v56 = vpop.f32.mrb[0].mxu0 }
 0x25c   : > { %v923_v57 = vpop.f32.mrb[1].mxu0 }
 0x25d   : > { %v924_v59 = vadd.f32 %v923_v57, %v922_v56 }
 0x25e   : > { %v634_v60 = vpop.f32.mrb[0].mxu1 }
 0x25f   : > { %v635_v61 = vadd.f32 %v924_v59, %v634_v60  ;;  %v962_v63 = vpop.f32.mrb[1].mxu1  ;;  %v925_v2 = vpop.f32.mrb[2].mxu0 }
 0x260   : > { %v926_v3 = vpop.f32.mrb[3].mxu0 }
 0x261   : > { %v752_v4 = vmax.f32 %v635_v61, 0.0  ;;  %v927_v0 = vadd.f32 %v926_v3, %v925_v2 }
 0x262   : > { %v639_v9 = vpop.f32.mrb[2].mxu1 }
 0x263   : > { %755 = vst [vmem:[%s213_s26] sm:$0xff] %v752_v4  ;;  %v640_v6 = vadd.f32 %v927_v0, %v639_v9  ;;  %v965_v18 = vpop.f32.mrb[3].mxu1  ;;  %v928_v7 = vpop.f32.mrb[4].mxu0 }
 0x264   : > { %v929_v8 = vpop.f32.mrb[5].mxu0 }
 0x265   : > { %v753_v53 = vmax.f32 %v640_v6, 0.0  ;;  %v930_v62 = vadd.f32 %v929_v8, %v928_v7 }
 0x267   : > { %756 = vst [vmem:[%s213_s26 + $0x8] sm:$0xff] %v753_v53  ;;  %v644_v5 = vpop.f32.mrb[4].mxu1 }
 0x268   : > { %v645_v14 = vadd.f32 %v930_v62, %v644_v5  ;;  %v968_v15 = vpop.f32.mrb[5].mxu1 }
 0x26a   : > { %v754_v16 = vmax.f32 %v645_v14, 0.0 }
 0x26b   : > { %v748_v21 = vpop.f32.mrb[6].mxu1 }
 0x26c   : > { %757 = vst [vmem:[%s213_s26 + $0x10] sm:$0xff] %v754_v16  ;;  %v758_v23 = vmax.f32 %v748_v21, 0.0  ;;  %v973_v10 = vpop.f32.mrb[7].mxu1 }
 0x26e   : > { %759 = vst [vmem:[%s213_s26 + $0x18] sm:$0xff] %v758_v23 }
 0x26f   : > { %1406 = shalt.err (!%p1403_p2)
}
 0x270   : > { %s1407_s21 = scalar_lea.hbm %s1894_s5, 512  ;;  %s1411_s20 = scalar_lea.hbm %s1941_s3, 1024 }
 0x271   : > { %p1408_p13 = scmp.ne.s32.totalorder %s1894_s5, %s1407_s21  ;;  %p1412_p4 = scmp.lt.u32.totalorder %s1894_s5, %s1941_s3 }
 0x272   : > { %p1413_p5 = scmp.lt.u32.totalorder %s1411_s20, %s1407_s21  ;;  %p1415_p8 = scmp.lt.u32.totalorder %s1407_s21, %s1894_s5 }
 0x273   : > { %p1409_p6 = pnand %p1408_p13, %p1955_p0 }
 0x274   : > { %p1414_p11 = por %p1413_p5, %p1412_p4 }
 0x275   : > { %p1410_p10 = pneg %p1409_p6 }
 0x276   : > { %p1416_p1 = por %p1415_p8, %p1414_p11 }
 0x278   : > { %p1417_p3 = pnand %p1416_p1, %p1410_p10 }
 0x27a   : > { %1420 = shalt.err (!%p1417_p3)
}
 0x27b   : > { %s1494_s18 = smov 128   ;;  %s1495_s26 = smov 8  }
 0x27c   : > { %1028 = dma.vmem_to_hbm [thread:$0]  (%p1955_p0), %s1889_s27, 512, %s1894_s5, %s761_s8, %s1494_s18, %s1494_s18, %s1495_s26  }
 0x27d PF: > { %s789_s29 = sand.u32 1, %s1451_s12   ;;  %p1956_p7 = scmp.ne.s32.totalorder %s1946_s19, 0 }
 0x27e   : > { %p1957_p9 = scmp.ge.s32.totalorder %s1463_s15, 2  ;;  %s790_s30 = scalar_lea.sflag [#allocation4], %s789_s29 }
 0x280   : > { %p1042_p12 = pnand %p1957_p9, %p1956_p7 }
 0x282   : > { %1446 = dma.done.wait (!%p1042_p12), %s790_s30, 512  }
 0x283   : > { %1448 = vsyncadd (!%p1042_p12), %s790_s30, 4294966784  ;;  %p17_p2 = scmp.ge.s32.totalorder %s1626_s4, 4   ;;  %s1958_s12 = smov %s1455_s13 }
 0x284   : > { %s1959_s13 = smov %s1459_s14  ;;  %s1960_s14 = smov %s1642_s7 }
 0x285   : > { %s1961_s15 = smov %s1626_s4  ;;  %19 = sbr.rel (!%p17_p2) target bundleno = 6 (0x6), region = 85 }
 0x28c   :  { %795 = vsyncpa [#allocation3], 1 }
 0x28d   :  { %797 = vsyncpa [#allocation3 + $0x1], 1 }
 0x28e   :  { %798 = vsyncpa [#allocation6], 1 }
 0x28f   :  { %799 = vsyncpa [#allocation4], 1 }
 0x290   :  { %801 = vsyncpa [#allocation4 + $0x1], 1 }

</bundles_post_ra>
